<compile_context>
chip_gen: v7x
topology: tpu7x:2x2x1
jax: 0.10.0
libtpu: 0.0.40
codegen_flags: <defaults>
</compile_context>

<pallas_src>
import math

import jax
import jax.numpy as jnp
from jax.experimental import pallas as pl
from jax.experimental.pallas import tpu as pltpu


def _drop_path_kernel(scale_ref, keep_ref, x_ref, o_ref):
    # scale_ref: (B,) f32 in SMEM (0.0 or 1/keep_prob).  keep_ref unused here
    # (it only drives the input index_map).  x_ref/o_ref: (1, TM, D) VMEM tiles.
    del keep_ref
    b = pl.program_id(0)
    s = scale_ref[b]
    o_ref[...] = x_ref[...] * s.astype(x_ref.dtype)


def _lane_dense_view(shape):
    """Collapse (B, ...) to a lane-dense (B, M, D) view.

    Prefers a last dim that is a multiple of 128 so output stores are
    unmasked; falls back to (B, prod(mid), last) when that is impossible.
    """
    B = shape[0]
    if len(shape) == 1:
        return B, 1, 1
    D = shape[-1]
    M = int(math.prod(shape[1:-1]))
    E = M * D
    if D % 128 != 0 and E % 128 == 0 and E >= 128:
        return B, E // 128, 128
    return B, M, D


def _choose_tm(B, M, D, itemsize, target_bytes=4 << 20, min_steps=4):
    """Row tile over the collapsed middle axis: ~target_bytes per block, a
    multiple of the packed sublane count (or the full axis), shrunk when the
    grid would otherwise be too short to pipeline."""
    sub = 8 * max(1, 4 // itemsize)           # 8 (f32) / 16 (bf16) / 32 (i8)
    rows = max(sub, target_bytes // max(1, D * itemsize))
    rows -= rows % sub
    rows = max(sub, rows)
    tm = M if rows >= M else rows
    # Keep the double-buffered pipeline fed (>= min_steps) when layout-legal.
    while B * pl.cdiv(M, tm) < min_steps and tm > sub and tm % sub == 0:
        new_tm = tm // 2
        new_tm -= new_tm % sub
        new_tm = max(sub, new_tm)
        if new_tm == tm:
            break
        tm = new_tm
    return int(tm)


def drop_path(x, key, drop_prob: float = 0.0, training: bool = False):
    """Pallas implementation of DropPath.forward.

    x: (B, ...) float array (ViT token layout is (B, N, D)).
    key: jax PRNG key for the per-sample uniforms (torch.rand analog).
    """
    drop_prob = float(drop_prob or 0.0)
    if drop_prob == 0.0 or not training:
        return x

    keep_prob = 1.0 - drop_prob
    orig_shape = x.shape
    B, M, D = _lane_dense_view(orig_shape)
    xv = x.reshape(B, M, D)

    itemsize = jnp.dtype(xv.dtype).itemsize
    TM = _choose_tm(B, M, D, itemsize)

    # Per-sample binarized mask, folded with 1/keep_prob (computed in f32).
    u = jax.random.uniform(key, (B,), dtype=jnp.float32)
    mask = jnp.floor(keep_prob + u)                     # (B,) f32: 0.0 or 1.0
    scale = mask / keep_prob                            # (B,) f32: 0 or 1/kp
    keep = mask.astype(jnp.int32)                       # (B,) i32: 0 or 1

    grid = (B, pl.cdiv(M, TM))

    # Input index_map: dropped samples keep pointing at block 0, so Pallas
    # skips the refetch on consecutive inner-m steps (the *0 multiply still
    # produces exact zeros).  Output index_map always advances.
    def x_index_map(b, m, scale_ref, keep_ref):
        del scale_ref
        return (b, m * keep_ref[b], 0)

    def o_index_map(b, m, scale_ref, keep_ref):
        del scale_ref, keep_ref
        return (b, m, 0)

    out = pl.pallas_call(
        _drop_path_kernel,
        out_shape=jax.ShapeDtypeStruct((B, M, D), xv.dtype),
        grid_spec=pltpu.PrefetchScalarGridSpec(
            num_scalar_prefetch=2,                      # scale, keep -> SMEM
            grid=grid,
            in_specs=[pl.BlockSpec((1, TM, D), x_index_map)],
            out_specs=pl.BlockSpec((1, TM, D), o_index_map),
        ),
        compiler_params=pltpu.CompilerParams(
            dimension_semantics=("parallel", "parallel"),
            vmem_limit_bytes=32 * 1024 * 1024,
        ),
        cost_estimate=pl.CostEstimate(
            flops=int(xv.size),
            transcendentals=0,
            bytes_accessed=2 * int(xv.size) * itemsize,
        ),
        # Operands: 0=scale (prefetch), 1=keep (prefetch), 2=x -> output 0.
        input_output_aliases={2: 0},
    )(scale, keep, xv)

    return out.reshape(orig_shape)


class DropPath:
    """Mirror of the PyTorch module (no parameters)."""

    def __init__(self, drop_prob=None):
        self.drop_prob = drop_prob
        self.training = True

    def __call__(self, x, key):
        return drop_path(x, key, self.drop_prob, self.training)


if __name__ == "__main__":
    key = jax.random.PRNGKey(0)
    kx, kmask = jax.random.split(key)

    B, N, D = 2, 8, 32
    x = jax.random.normal(kx, (B, N, D), dtype=jnp.float32)

    drop_prob = 0.25
    keep_prob = 1.0 - drop_prob

    module = DropPath(drop_prob=drop_prob)
    module.training = True

    # Pure-JAX reference using the same uniforms the wrapper draws.
    u = jax.random.uniform(kmask, (B,), dtype=jnp.float32)
    mask = jnp.floor(keep_prob + u)
    ref = x / keep_prob * mask.reshape(B, 1, 1)

    out = jax.block_until_ready(module(x, kmask))
    assert out.shape == x.shape and out.dtype == x.dtype
    assert jnp.allclose(out, ref, atol=1e-6, rtol=1e-6), "mismatch vs reference"

    # Eval mode / drop_prob=0 -> identity path (no kernel launch).
    module.training = False
    out_eval = jax.block_until_ready(module(x, kmask))
    assert jnp.array_equal(out_eval, x)

    print("KERNEL_OK")
</pallas_src>

<mosaic_0001>
module attributes {stable_mosaic.version = 11 : i64} {
  func.func @_drop_path_kernel(%arg0: i32, %arg1: i32, %arg2: memref<2xf32, #tpu.memory_space<smem>>, %arg3: memref<2xi32, #tpu.memory_space<smem>>, %arg4: memref<1x2x128xf32, #tpu.memory_space<vmem>>, %arg5: memref<1x2x128xf32, #tpu.memory_space<vmem>>) attributes {dimension_semantics = [#tpu.dimension_semantics<parallel>, #tpu.dimension_semantics<parallel>], iteration_bounds = array<i64: 2, 1>, scalar_prefetch = 2 : i64, scratch_operands = 0 : i64, tpu.core_type = #tpu.core_type<tc>, window_params = [{transform_indices = @transform_0, window_bounds = array<i64: 1, 2, 128>}, {transform_indices = @transform_1, window_bounds = array<i64: 1, 2, 128>}]} {
    %0 = arith.index_cast %arg0 : i32 to index
    %1 = memref.load %arg2[%0] : memref<2xf32, #tpu.memory_space<smem>>
    %c0 = arith.constant 0 : index
    %c0_0 = arith.constant 0 : index
    %c0_1 = arith.constant 0 : index
    %2 = vector.load %arg4[%c0, %c0_0, %c0_1] : memref<1x2x128xf32, #tpu.memory_space<vmem>>, vector<1x2x128xf32>
    %3 = vector.broadcast %1 : f32 to vector<1x2x128xf32>
    %4 = arith.mulf %2, %3 : vector<1x2x128xf32>
    %c0_2 = arith.constant 0 : index
    %c0_3 = arith.constant 0 : index
    %c0_4 = arith.constant 0 : index
    %5 = vector.load %arg5[%c0_2, %c0_3, %c0_4] : memref<1x2x128xf32, #tpu.memory_space<vmem>>, vector<1x2x128xf32>
    tpu.vector_store %arg5[%c0_2, %c0_3, %c0_4], %4 {strides = array<i32>} : memref<1x2x128xf32, #tpu.memory_space<vmem>>, vector<1x2x128xf32>,
    return
  }
  func.func @transform_0(%arg0: i32, %arg1: i32, %arg2: memref<2xf32, #tpu.memory_space<smem>>, %arg3: memref<2xi32, #tpu.memory_space<smem>>) -> (i32, i32, i32) {
    %0 = arith.index_cast %arg0 : i32 to index
    %1 = memref.load %arg3[%0] : memref<2xi32, #tpu.memory_space<smem>>
    %2 = arith.muli %arg1, %1 : i32
    %c0_i32 = arith.constant 0 : i32
    %c0_i32_0 = arith.constant 0 : i32
    return %arg0, %2, %c0_i32 : i32, i32, i32
  }
  func.func @transform_1(%arg0: i32, %arg1: i32, %arg2: memref<2xf32, #tpu.memory_space<smem>>, %arg3: memref<2xi32, #tpu.memory_space<smem>>) -> (i32, i32, i32) {
    %c0_i32 = arith.constant 0 : i32
    %c0_i32_0 = arith.constant 0 : i32
    return %arg0, %arg1, %c0_i32 : i32, i32, i32
  }
}

</mosaic_0001>

<bundles_post_ra>
// kernel: tpu_custom_call.1
= control target key start
LH: loop header
LB: loop body
LE: loop exit
PB: predicated region body
PF: predicated region fallthrough
CT: control target
= control target key end

     0   :  { %s689_s0 = inlined_call_operand.vmem [shape: f32[2], index: 0, kind: input, shape index: {}]   ;;  %s690_s2 = inlined_call_operand.hbm [shape: f32[2,2,128], index: 2, kind: input, shape index: {}, may-alias: {2,3}]   ;;  %s691_s3 = inlined_call_operand.hbm [shape: f32[2,2,128], index: 3, kind: output, shape index: {}, may-alias: {2,3}]   ;;  %s692_s1 = inlined_call_operand.vmem [shape: s32[2], index: 1, kind: input, shape index: {}]  }
   0x1   :  { %s8_s14 = sshll.u32 %s689_s0, 4  ;;  %s12_s17 = sshll.u32 %s692_s1, 4  ;;  %s9_s14 = int_to_ptr.vmem [resolvable:$true] %s8_s14  ;;  %s13_s17 = int_to_ptr.vmem [resolvable:$true] %s12_s17 }
   0x2   :  { %s346_s18 = scalar_lea.vmem %s9_s14, 16  ;;  %p351_p1 = scmp.lt.s32.totalorder %s9_s14, %s9_s14 }
   0x3   :  { %p347_p0 = scmp.ne.s32.totalorder %s9_s14, %s346_s18  ;;  %p352_p2 = scmp.lt.s32.totalorder %s346_s18, %s346_s18 }
   0x5   :  { %p353_p3 = por %p352_p2, %p351_p1 }
   0x7   :  { %p354_p4 = pnand %p353_p3, %p347_p0 }
   0x9   :  { %357 = shalt.err (!%p354_p4)  }
   0xa   :  { %s486_s19 = smov [#allocation3]   ;;  %s358_s20 = scalar_lea.vmem %s13_s17, 16 }
   0xb   :  { %11 = dma.vmem_to_smem %s9_s14, 16, %s486_s19, [#allocation2] }
   0xc   :  { %p359_p5 = scmp.ne.s32.totalorder %s13_s17, %s358_s20  ;;  %p363_p6 = scmp.lt.s32.totalorder %s13_s17, %s13_s17 }
   0xd   :  { %p364_p7 = scmp.lt.s32.totalorder %s358_s20, %s358_s20 }
   0xf   :  { %p365_p8 = por %p364_p7, %p363_p6 }
  0x11   :  { %p366_p9 = pnand %p365_p8, %p359_p5 }
  0x13   :  { %369 = shalt.err (!%p366_p9)  }
  0x14   :  { %s487_s0 = smov [#allocation4]  }
  0x15   :  { %15 = dma.vmem_to_smem %s13_s17, 16, %s487_s0, [#allocation2] }
  0x16   :  { %452 = dma.done.wait [#allocation2], 32 }
  0x17   :  { %453 = vsyncadd [#allocation2], 4294967264 }
  0x18   :  { %17 = sfence }
  0x19   :  { %18 = vsyncpa [#allocation6], 0 }
  0x1a   :  { %20 = vsyncpa [#allocation6 + $0x1], 0 }
  0x1b   :  { %21 = vsyncpa [#allocation7], 0 }
  0x1c   :  { %23 = vsyncpa [#allocation7 + $0x1], 0  ;;  %s516_s1 = smov 0   ;;  %s518_s21 = smov 0  }
  0x1d   :  { %s520_s22 = smov 0   ;;  %s522_s23 = smov 0  }
  0x1e   :  { %s524_s24 = smov 0   ;;  %s526_s25 = smov 0  }
  0x1f LB: > { %s269_s26 = sadd.s32 4294967295, %s484_s25   ;;  %s270_s27 = sadd.s32 4294967294, %s484_s25   ;;  %s484_s25 = sphi %s526_s25, %s29_s25   ;;  %s480_s24 = sphi %s524_s24, %s708_s24   ;;  %s476_s23 = sphi %s522_s23, %s707_s23   ;;  %s472_s22 = sphi %s520_s22, %s706_s22   ;;  %s468_s21 = sphi %s518_s21, %s705_s21   ;;  %s464_s1 = sphi %s516_s1, %s704_s1  }
  0x20   : > { %s41_s28 = sadd.s32 1, %s480_s24  ;;  %s54_s29 = sadd.s32 1, %s472_s22 }
  0x21   : > { %p43_p10 = scmp.ge.s32.totalorder %s41_s28, 2  ;;  %p61_p11 = scmp.ne.s32.totalorder %s472_s22, %s468_s21 }
  0x22   : > { %p62_p12 = scmp.eq.s32.totalorder %s484_s25, 0  ;;  %p67_p13 = scmp.ne.s32.totalorder %s468_s21, %s464_s1 }
  0x23   : > { %s710_s28 = smov (%p43_p10, %s41_s28), 0  ;;  %p68_p1 = scmp.eq.s32.totalorder %s269_s26, 0 }
  0x24   : > { %p557_p0 = por %p62_p12, %p61_p11  ;;  %s49_s4 = ssub.s32 %s480_s24, %s710_s28 }
  0x25   : > { %p93_p2 = scmp.eq.s32.totalorder %s269_s26, 1  ;;  %p52_p3 = scmp.eq.s32.totalorder %s49_s4, 0 }
  0x26   : > { %p563_p4 = por %p68_p1, %p67_p13  ;;  %p99_p6 = scmp.eq.s32.totalorder %s270_s27, 1 }
  0x27   : > { %p567_p5 = por %p93_p2, %p61_p11  ;;  %p294_p9 = scmp.lt.s32.totalorder %s484_s25, 2 }
  0x28   : > { %s572_s7 = scalar_select %p52_p3, %s472_s22, %s54_s29  }
  0x29   : > { %s696_s6 = scalar_select %p567_p5, 1, 0 }
  0x2a   : > { %p574_p7 = por %p99_p6, %p67_p13  ;;  %s119_s9 = sand.u32 1, %s472_s22  }
  0x2b   : > { %s273_s10 = sshll.u32 %s119_s9, 1  ;;  %s274_s11 = sshll.u32 %s480_s24, 5 }
  0x2c   : > { %s697_s8 = scalar_select %p574_p7, 1, 0 }
  0x2d   : > { %s585_s14 = scalar_lea.hbm %s690_s2, %s274_s11  ;;  %s123_s15 = scalar_lea.vmem [#allocation5], %s273_s10 }
  0x2e   : > { %s133_s16 = sshll.u32 %s123_s15, 4  ;;  %p591_p10 = pnand %p294_p9, %p557_p0  ;;  %s587_s16 = int_to_ptr.vmem [resolvable:$true] %s133_s16 }
  0x2f   : > { %s120_s18 = scalar_lea.sflag [#allocation6], %s119_s9  ;;  %s370_s19 = scalar_lea.hbm %s585_s14, 32 }
  0x30   : > { %p371_p13 = scmp.ne.s32.totalorder %s585_s14, %s370_s19  ;;  %p372_p1 = pneg %p591_p10 }
  0x31   : > { %s375_s26 = scalar_lea.hbm %s690_s2, 64  ;;  %p376_p0 = scmp.lt.u32.totalorder %s585_s14, %s690_s2 }
  0x32   : > { %p373_p2 = pnand %p372_p1, %p371_p13  ;;  %p377_p6 = scmp.lt.u32.totalorder %s375_s26, %s370_s19 }
  0x33   : > { %p379_p8 = scmp.lt.u32.totalorder %s370_s19, %s585_s14 }
  0x34   : > { %p374_p3 = pneg %p373_p2  ;;  %p378_p9 = por %p377_p6, %p376_p0 }
  0x36   : > { %p380_p11 = por %p379_p8, %p378_p9 }
  0x38   : > { %p381_p12 = pnand %p380_p11, %p374_p3 }
  0x3a   : > { %384 = shalt.err (!%p381_p12)
}
  0x3b   : > { %s385_s30 = scalar_lea.vmem %s587_s16, 32  ;;  %s488_s4 = smov [#allocation5]  }
  0x3c   : > { %p386_p13 = scmp.ne.s32.totalorder %s587_s16, %s385_s30  ;;  %s390_s9 = sshll.u32 %s488_s4, 4  ;;  %s391_s9 = int_to_ptr.vmem [resolvable:$false] %s390_s9 }
  0x3d   : > { %s392_s10 = scalar_lea.vmem %s391_s9, 64  ;;  %p393_p5 = scmp.lt.s32.totalorder %s587_s16, %s391_s9 }
  0x3e   : > { %p388_p2 = pnand %p386_p13, %p372_p1  ;;  %p394_p0 = scmp.lt.s32.totalorder %s392_s10, %s385_s30 }
  0x40   : > { %p389_p7 = pneg %p388_p2  ;;  %p395_p6 = por %p394_p0, %p393_p5 }
  0x42   : > { %p396_p8 = pnand %p395_p6, %p389_p7 }
  0x44   : > { %399 = shalt.err (!%p396_p8)
}
  0x45   : > { %289 = dma.hbm_to_vmem [thread:$0]  (!%p591_p10), %s585_s14, 32, %s587_s16, %s120_s18  }
  0x46   : > { %p699_p11 = scmp.lt.s32.totalorder %s484_s25, 3  ;;  %p700_p12 = scmp.ge.s32.totalorder %s484_s25, 1 }
  0x48   : > { %p139_p1 = pnand %p700_p12, %p699_p11 }
  0x49   : > { %s627_s11 = sand.u32 (!%p139_p1), 1, %s468_s21  }
  0x4a   : > { %142 = sbr.rel (%p139_p1) target bundleno = 108 (0x6c), region = 24  ;;  %s276_s12 = sshll.u32 (!%p139_p1), %s627_s11, 1 }
  0x4b   : > { %s145_s13 = scalar_lea.sflag (!%p139_p1), [#allocation6], %s627_s11  ;;  %s148_s15 = scalar_lea.vmem (!%p139_p1), [#allocation5], %s276_s12 }
  0x51   : > { %455 = dma.done.wait (%p563_p4), %s145_s13, 32  }
  0x52   : > { %457 = vsyncadd (%p563_p4), %s145_s13, 4294967264  ;;  %s169_s14 = sld [smem:[#allocation3 + %s476_s23]]  ;;  %s166_s16 = scalar_lea.vmem [#allocation8], %s276_s12  ;;  %v170_v0 = vld [vmem:[%s148_s15] sm:$0x3] }
  0x53   : > { %s189_s17 = sshll.u32 %s166_s16, 4  ;;  %s279_s18 = sshll.u32 %s476_s23, 5  ;;  %s637_s17 = int_to_ptr.vmem [resolvable:$true] %s189_s17 }
  0x54   : > { %s642_s5 = scalar_lea.hbm %s691_s3, %s279_s18  ;;  %s175_s0 = scalar_lea.sflag [#allocation7], %s627_s11 }
  0x55   : > { %s400_s26 = scalar_lea.vmem %s637_s17, 32  ;;  %p701_p5 = scmp.ne.s32.totalorder %s696_s6, 0 }
  0x56   : > { %p401_p4 = scmp.ne.s32.totalorder %s637_s17, %s400_s26  ;;  %s489_s23 = smov [#allocation8]  }
  0x57   : > { %s404_s27 = sshll.u32 %s489_s23, 4  ;;  %s405_s27 = int_to_ptr.vmem [resolvable:$false] %s404_s27 }
  0x58   : > { %v171_v1 = vstv %s169_s14  ;;  %p402_p7 = pnand %p401_p4, %p701_p5  ;;  %s406_s29 = scalar_lea.vmem %s405_s27, 64 }
  0x59   : > { %v172_v2 = vmul.f32 %v171_v1, %v170_v0  ;;  %p407_p3 = scmp.lt.s32.totalorder %s637_s17, %s405_s27  ;;  %p408_p9 = scmp.lt.s32.totalorder %s406_s29, %s400_s26 }
  0x5a   : > { %p403_p10 = pneg %p402_p7 }
  0x5b   : > { %173 = vst [vmem:[%s166_s16] sm:$0x3] %v172_v2  ;;  %p409_p13 = por %p408_p9, %p407_p3 }
  0x5d   : > { %p410_p2 = pnand %p409_p13, %p403_p10 }
  0x5f   : > { %413 = shalt.err (!%p410_p2)
}
  0x60   : > { %s414_s30 = scalar_lea.hbm %s642_s5, 32  ;;  %s418_s10 = scalar_lea.hbm %s691_s3, 64 }
  0x61   : > { %p415_p0 = scmp.ne.s32.totalorder %s642_s5, %s414_s30  ;;  %p419_p11 = scmp.lt.u32.totalorder %s642_s5, %s691_s3 }
  0x62   : > { %p420_p12 = scmp.lt.u32.totalorder %s418_s10, %s414_s30  ;;  %p422_p4 = scmp.lt.u32.totalorder %s414_s30, %s642_s5 }
  0x63   : > { %p416_p6 = pnand %p415_p0, %p701_p5 }
  0x64   : > { %p421_p1 = por %p420_p12, %p419_p11 }
  0x65   : > { %p417_p8 = pneg %p416_p6 }
  0x66   : > { %p423_p7 = por %p422_p4, %p421_p1 }
  0x68   : > { %p424_p10 = pnand %p423_p7, %p417_p8 }
  0x6a   : > { %427 = shalt.err (!%p424_p10)
}
  0x6b   : > { %284 = dma.vmem_to_hbm [thread:$0]  (%p701_p5), %s637_s17, 32, %s642_s5, %s175_s0  }
  0x6c PF: > { %s201_s13 = sand.u32 1, %s464_s1   ;;  %p702_p3 = scmp.ne.s32.totalorder %s697_s8, 0 }
  0x6d   : > { %p703_p9 = scmp.ge.s32.totalorder %s484_s25, 2  ;;  %s202_s15 = scalar_lea.sflag [#allocation7], %s201_s13 }
  0x6f   : > { %p291_p13 = pnand %p703_p9, %p702_p3 }
  0x71   : > { %459 = dma.done.wait (!%p291_p13), %s202_s15, 32  }
  0x72   : > { %461 = vsyncadd (!%p291_p13), %s202_s15, 4294967264  ;;  %s29_s25 = sadd.s32 1, %s484_s25   ;;  %s704_s1 = smov %s468_s21 }
  0x73   : > { %p26_p2 = scmp.ge.s32.totalorder %s29_s25, 4   ;;  %s705_s21 = smov %s472_s22 }
  0x74   : > { %s706_s22 = smov %s572_s7  ;;  %s707_s23 = smov %s480_s24 }
  0x75   : > { %s708_s24 = smov %s710_s28  ;;  %28 = sbr.rel (!%p26_p2) target bundleno = 31 (0x1f), region = 69 }
  0x7c   :  { %207 = vsyncpa [#allocation6], 1 }
  0x7d   :  { %209 = vsyncpa [#allocation6 + $0x1], 1 }
  0x7e   :  { %210 = vsyncpa [#allocation7], 1 }
  0x7f   :  { %212 = vsyncpa [#allocation7 + $0x1], 1 }

</bundles_post_ra>
